<compile_context>
chip_gen: v7x
topology: tpu7x:2x2x1
jax: 0.10.0
libtpu: 0.0.40
codegen_flags: <defaults>
</compile_context>

<pallas_src>
import numpy as np
import jax
import jax.numpy as jnp
from jax.experimental import pallas as pl
from jax.experimental.pallas import tpu as pltpu


def _round_up(x: int, m: int) -> int:
    return ((x + m - 1) // m) * m


def _split_bf16x3(t):
    """Split an f32 array into three bf16 components hi, mid, lo such that
    f32(hi) + f32(mid) + f32(lo) == t bit-exactly (Dekker-style splitting:
    every subtraction below is exact in f32, and every partial re-sum of the
    three components fits in f32's 24-bit significand)."""
    t = t.astype(jnp.float32)
    hi = t.astype(jnp.bfloat16)
    r1 = t - hi.astype(jnp.float32)               # exact
    mid = r1.astype(jnp.bfloat16)
    lo = (r1 - mid.astype(jnp.float32)).astype(jnp.bfloat16)   # residual bf16-exact
    return hi, mid, lo


def _embedding_gather_kernel(idx_ref, table_ref, out_ref):
    """One grid step: gather R embedding rows via a shared one-hot + 3 bf16 MXU dots.

    idx_ref:   (R, 1)          int32  offset-adjusted flat indices for this block
    table_ref: (3, V_pad, D)   bf16   VMEM-resident [hi, mid, lo] split table
    out_ref:   (R, D)          f32
    """
    r = idx_ref.shape[0]
    v_pad = table_ref.shape[1]

    idx = idx_ref[...]                                               # (R, 1)
    lane = jax.lax.broadcasted_iota(jnp.int32, (r, v_pad), 1)        # (R, V_pad)
    # One one-hot, shared by all three table components (bf16 -> single MXU pass).
    onehot = jnp.where(lane == idx, 1.0, 0.0).astype(table_ref.dtype)

    # hi + mid + lo of the selected row == exact f32 embedding:
    #   * each product is (1.0 or 0.0) * bf16 value -> exact in the f32 accumulator
    #   * the three f32 adds reconstruct the original f32 weight bit-exactly.
    acc = jnp.dot(onehot, table_ref[0], preferred_element_type=jnp.float32)
    acc = acc + jnp.dot(onehot, table_ref[1], preferred_element_type=jnp.float32)
    acc = acc + jnp.dot(onehot, table_ref[2], preferred_element_type=jnp.float32)
    out_ref[...] = acc.astype(out_ref.dtype)


def features_embedding_forward(x, offsets, table, *, block_rows=512):
    """Pallas implementation of FeaturesEmbedding.forward.

    Args:
      x:       (batch, num_fields) integer per-field feature indices.
      offsets: (num_fields,) int32 cumulative field offsets.
      table:   (sum(field_dims), embedding_dim) float32 embedding weights.

    Returns:
      (batch, num_fields, embedding_dim) float32 embeddings.
    """
    B, F = x.shape
    table = table.astype(jnp.float32)
    V, D = table.shape
    n = B * F

    # Offset add + flatten (cheap elementwise glue, mirrors `x + offsets.unsqueeze(0)`).
    flat_idx = (x.astype(jnp.int32) + offsets[None, :].astype(jnp.int32)).reshape(-1)

    # Block of R rows per grid step (multiple of 8 sublanes), pad the row count.
    n_pad8 = _round_up(n, 8)
    r_rows = min(_round_up(block_rows, 8), n_pad8)
    n_pad = _round_up(n, r_rows)
    if n_pad != n:
        flat_idx = jnp.pad(flat_idx, (0, n_pad - n))     # padded rows gather row 0
    idx2d = flat_idx.reshape(n_pad, 1)

    # VMEM-resident, lane-aligned, bf16x3-split table: shape (3, V_pad, D).
    v_pad = _round_up(V, 128)
    if v_pad > 2048:
        # TODO(synk): large-vocab path (HBM-resident table + manual blocked DMA row
        # gather, P4 pattern) — not needed for AFM-sized field_dims.
        raise NotImplementedError(
            "vocab too large for the VMEM-resident one-hot gather path")
    hi, mid, lo = _split_bf16x3(table)
    pad_rows = ((0, v_pad - V), (0, 0))
    table_x3 = jnp.stack(
        [jnp.pad(hi, pad_rows), jnp.pad(mid, pad_rows), jnp.pad(lo, pad_rows)],
        axis=0)                                           # (3, V_pad, D) bf16

    grid = (n_pad // r_rows,)
    table_bytes = 3 * v_pad * D * 2                       # bf16 split table
    idx_bytes = n_pad * 4
    out_bytes = n_pad * D * 4
    cost = pl.CostEstimate(
        flops=2 * n_pad * (3 * v_pad) * D,
        transcendentals=0,
        bytes_accessed=idx_bytes + table_bytes + out_bytes)

    # Raise the scoped VMEM limit only when the resident table / one-hot actually
    # need it (default scoped limit: 16 MiB on v5e, 32 MiB on v6e/v7x).
    onehot_bytes = r_rows * v_pad * 2
    vmem_need = 2 * table_bytes + 2 * (r_rows * 4 + r_rows * D * 4) \
        + onehot_bytes + (2 << 20)
    compiler_kwargs = dict(dimension_semantics=("parallel",))
    if vmem_need > (16 << 20):
        compiler_kwargs["vmem_limit_bytes"] = int(vmem_need)

    out = pl.pallas_call(
        _embedding_gather_kernel,
        out_shape=jax.ShapeDtypeStruct((n_pad, D), jnp.float32),
        grid=grid,
        in_specs=[
            # Per-step index block (VMEM, not SMEM prefetch -> scales with batch).
            pl.BlockSpec((r_rows, 1), lambda i: (i, 0)),
            # Whole (padded, split) table, constant index_map -> fetched once.
            pl.BlockSpec((3, v_pad, D), lambda i: (0, 0, 0)),
        ],
        out_specs=pl.BlockSpec((r_rows, D), lambda i: (i, 0)),
        compiler_params=pltpu.CompilerParams(**compiler_kwargs),
        cost_estimate=cost,
    )(idx2d, table_x3)

    return out[:n].reshape(B, F, D)


if __name__ == "__main__":
    # Module configuration (matches FeaturesEmbedding.__init__ shapes).
    field_dims = [10, 20, 30, 40]        # num_fields = 4
    embedding_dim = 32
    num_fields = len(field_dims)
    vocab = sum(field_dims)
    batch = 8

    # Deterministic parameter init (synthetic, no checkpoint).
    key = jax.random.PRNGKey(0)
    k_tab, k_x = jax.random.split(key)
    table = jax.random.normal(k_tab, (vocab, embedding_dim), dtype=jnp.float32)

    # Offsets: offsets[i] = sum(field_dims[:i]), same as _compute_offsets.
    offsets = jnp.asarray(np.concatenate([[0], np.cumsum(field_dims)[:-1]]),
                          dtype=jnp.int32)

    # Deterministic inputs: per-field indices in-range.
    keys = jax.random.split(k_x, num_fields)
    x = jnp.stack(
        [jax.random.randint(keys[f], (batch,), 0, field_dims[f], dtype=jnp.int32)
         for f in range(num_fields)], axis=1)            # (batch, num_fields)

    out = features_embedding_forward(x, offsets, table)
    out = jax.block_until_ready(out)

    # Reference check against plain-JAX take (same semantics as nn.Embedding).
    ref = jnp.take(table, x + offsets[None, :], axis=0)
    assert out.shape == (batch, num_fields, embedding_dim)
    np.testing.assert_allclose(np.asarray(out), np.asarray(ref),
                               rtol=1e-6, atol=1e-6)

    print("KERNEL_OK")
</pallas_src>

<mosaic_0001>
module attributes {stable_mosaic.version = 11 : i64} {
  func.func @_embedding_gather_kernel(%arg0: i32, %arg1: memref<32x1xi32, #tpu.memory_space<vmem>>, %arg2: memref<3x128x32xbf16, #tpu.memory_space<vmem>>, %arg3: memref<32x32xf32, #tpu.memory_space<vmem>>) attributes {dimension_semantics = [#tpu.dimension_semantics<parallel>], iteration_bounds = array<i64: 1>, scalar_prefetch = 0 : i64, scratch_operands = 0 : i64, tpu.core_type = #tpu.core_type<tc>, window_params = [{transform_indices = @transform_0, window_bounds = array<i64: 32, 1>}, {pipeline_mode = #tpu.pipeline_mode<synchronous>, transform_indices = @transform_1, window_bounds = array<i64: 3, 128, 32>}, {transform_indices = @transform_2, window_bounds = array<i64: 32, 32>}]} {
    %c0 = arith.constant 0 : index
    %c0_0 = arith.constant 0 : index
    %0 = vector.load %arg1[%c0, %c0_0] : memref<32x1xi32, #tpu.memory_space<vmem>>, vector<32x1xi32>
    %1 = tpu.iota {dimensions = array<i32: 1>} : vector<32x128xi32>
    %2 = vector.broadcast %0 : vector<32x1xi32> to vector<32x128xi32>
    %3 = arith.cmpi eq, %1, %2 : vector<32x128xi32>
    %cst = arith.constant 1.000000e+00 : f32
    %cst_1 = arith.constant 0.000000e+00 : f32
    %4 = vector.broadcast %cst : f32 to vector<32x128xf32>
    %5 = vector.broadcast %cst_1 : f32 to vector<32x128xf32>
    %6 = arith.select %3, %4, %5 : vector<32x128xi1>, vector<32x128xf32>
    %7 = arith.truncf %6 : vector<32x128xf32> to vector<32x128xbf16>
    %c0_2 = arith.constant 0 : index
    %c0_3 = arith.constant 0 : index
    %c0_4 = arith.constant 0 : index
    %8 = vector.load %arg2[%c0_2, %c0_3, %c0_4] : memref<3x128x32xbf16, #tpu.memory_space<vmem>>, vector<1x128x32xbf16>
    %9 = vector.shape_cast %8 : vector<1x128x32xbf16> to vector<128x32xbf16>
    %cst_5 = arith.constant dense<0.000000e+00> : vector<32x32xf32>
    %10 = tpu.matmul %7, %9, %cst_5 {dimension_numbers = #tpu.dot_dimension_numbers<[1], [0], [0], [1], [0, 0, 1, 1], [], []>} : vector<32x128xbf16>, vector<128x32xbf16>, vector<32x32xf32> -> vector<32x32xf32>
    %c1 = arith.constant 1 : index
    %c0_6 = arith.constant 0 : index
    %c0_7 = arith.constant 0 : index
    %11 = vector.load %arg2[%c1, %c0_6, %c0_7] : memref<3x128x32xbf16, #tpu.memory_space<vmem>>, vector<1x128x32xbf16>
    %12 = vector.shape_cast %11 : vector<1x128x32xbf16> to vector<128x32xbf16>
    %cst_8 = arith.constant dense<0.000000e+00> : vector<32x32xf32>
    %13 = tpu.matmul %7, %12, %cst_8 {dimension_numbers = #tpu.dot_dimension_numbers<[1], [0], [0], [1], [0, 0, 1, 1], [], []>} : vector<32x128xbf16>, vector<128x32xbf16>, vector<32x32xf32> -> vector<32x32xf32>
    %14 = arith.addf %10, %13 : vector<32x32xf32>
    %c2 = arith.constant 2 : index
    %c0_9 = arith.constant 0 : index
    %c0_10 = arith.constant 0 : index
    %15 = vector.load %arg2[%c2, %c0_9, %c0_10] : memref<3x128x32xbf16, #tpu.memory_space<vmem>>, vector<1x128x32xbf16>
    %16 = vector.shape_cast %15 : vector<1x128x32xbf16> to vector<128x32xbf16>
    %cst_11 = arith.constant dense<0.000000e+00> : vector<32x32xf32>
    %17 = tpu.matmul %7, %16, %cst_11 {dimension_numbers = #tpu.dot_dimension_numbers<[1], [0], [0], [1], [0, 0, 1, 1], [], []>} : vector<32x128xbf16>, vector<128x32xbf16>, vector<32x32xf32> -> vector<32x32xf32>
    %18 = arith.addf %14, %17 : vector<32x32xf32>
    %c0_12 = arith.constant 0 : index
    %c0_13 = arith.constant 0 : index
    %19 = vector.load %arg3[%c0_12, %c0_13] : memref<32x32xf32, #tpu.memory_space<vmem>>, vector<32x32xf32>
    tpu.vector_store %arg3[%c0_12, %c0_13], %18 {strides = array<i32>} : memref<32x32xf32, #tpu.memory_space<vmem>>, vector<32x32xf32>,
    return
  }
  func.func @transform_0(%arg0: i32) -> (i32, i32) {
    %c0_i32 = arith.constant 0 : i32
    %c0_i32_0 = arith.constant 0 : i32
    return %arg0, %c0_i32 : i32, i32
  }
  func.func @transform_1(%arg0: i32) -> (i32, i32, i32) {
    %c0_i32 = arith.constant 0 : i32
    %c0_i32_0 = arith.constant 0 : i32
    %c0_i32_1 = arith.constant 0 : i32
    %c0_i32_2 = arith.constant 0 : i32
    return %c0_i32, %c0_i32_0, %c0_i32_1 : i32, i32, i32
  }
  func.func @transform_2(%arg0: i32) -> (i32, i32) {
    %c0_i32 = arith.constant 0 : i32
    %c0_i32_0 = arith.constant 0 : i32
    return %arg0, %c0_i32 : i32, i32
  }
}

</mosaic_0001>

<bundles_post_ra>
// kernel: tpu_custom_call.1
= control target key start
LH: loop header
LB: loop body
LE: loop exit
PB: predicated region body
PF: predicated region fallthrough
CT: control target
= control target key end

     0   :  { %v628_v2 = vmov 0   ;;  %s754_s0 = inlined_call_operand.vmem [shape: s32[32,1], index: 0, kind: input, shape index: {}]   ;;  %s755_s1 = inlined_call_operand.vmem [shape: bf16[3,128,32], index: 1, kind: input, shape index: {}]   ;;  %s756_s2 = inlined_call_operand.hbm [shape: f32[32,32], index: 2, kind: output, shape index: {}]  }
   0x1   :  { %v15_v0 = vld [vmem:[%s754_s0 + $0x10] sm:$0xff]  ;;  %v13_v1 = vld [vmem:[%s754_s0] sm:$0xff]  ;;  %579 = vset.pattern.permute.xlu1 %v628_v2  ;;  %578 = vset.pattern.permute.xlu0 %v628_v2  ;;  %v16_v3 = vld [vmem:[%s754_s0 + $0x18] sm:$0xff] }
   0x2   :  { %v14_v4 = vld [vmem:[%s754_s0 + $0x8] sm:$0xff]  ;;  %26 = vperm.xlu1 %579, %v15_v0   ;;  %20 = vperm.xlu0 %578, %v13_v1   ;;  %v580_v5 = vld [vmem:[%s755_s1] sm:$0xff]   ;;  %v584_v9 = vld [vmem:[%s755_s1 + $0x10] sm:$0xff]  }
   0x3   :  { %v581_v6 = vld [vmem:[%s755_s1 + $0x40] sm:$0xff]   ;;  %525 = vmatprep.subr.bf16.mxu0 %v580_v5  ;;  %v582_v7 = vld [vmem:[%s755_s1 + $0x8] sm:$0xff]   ;;  %v585_v10 = vld [vmem:[%s755_s1 + $0x50] sm:$0xff]  }
   0x4   :  { %505 = vmatprep.subr.bf16.mxu1 %v581_v6  ;;  %526 = vmatpush3.bf16.msra.mxu0 %v580_v5  ;;  %v583_v8 = vld [vmem:[%s755_s1 + $0x48] sm:$0xff]   ;;  %v586_v11 = vld [vmem:[%s755_s1 + $0x18] sm:$0xff]   ;;  %v588_v13 = vld [vmem:[%s755_s1 + $0x20] sm:$0xff]  }
   0x5   :  { %506 = vmatpush3.bf16.msra.mxu1 %v581_v6  ;;  %527 = vmatprep.subr.bf16.mxu0 %v582_v7  ;;  %v587_v12 = vld [vmem:[%s755_s1 + $0x58] sm:$0xff]   ;;  %v589_v14 = vld [vmem:[%s755_s1 + $0x60] sm:$0xff]   ;;  %v590_v15 = vld [vmem:[%s755_s1 + $0x28] sm:$0xff]  }
   0x6   :  { %29 = vperm.xlu1 %579, %v16_v3   ;;  %23 = vperm.xlu0 %578, %v14_v4   ;;  %v591_v16 = vld [vmem:[%s755_s1 + $0x68] sm:$0xff]   ;;  %v592_v17 = vld [vmem:[%s755_s1 + $0x30] sm:$0xff]  }
   0x7   :  { %507 = vmatprep.subr.bf16.mxu1 %v583_v8  ;;  %v593_v18 = vld [vmem:[%s755_s1 + $0x70] sm:$0xff]  }
   0x8   :  { %528 = vmatpush3.bf16.msra.mxu0 %v582_v7 }
   0x9   :  { %529 = vmatprep.subr.bf16.mxu0 %v584_v9  ;;  %508 = vmatpush3.bf16.msra.mxu1 %v583_v8 }
   0xa   :  { %509 = vmatprep.subr.bf16.mxu1 %v585_v10 }
   0xc   :  { %530 = vmatpush3.bf16.msra.mxu0 %v584_v9 }
   0xd   :  { %531 = vmatprep.subr.bf16.mxu0 %v586_v11  ;;  %510 = vmatpush3.bf16.msra.mxu1 %v585_v10 }
   0xe   :  { %511 = vmatprep.subr.bf16.mxu1 %v587_v12 }
  0x10   :  { %532 = vmatpush3.bf16.msra.mxu0 %v586_v11 }
  0x11   :  { %533 = vmatprep.subr.bf16.mxu0 %v588_v13  ;;  %512 = vmatpush3.bf16.msra.mxu1 %v587_v12 }
  0x12   :  { %513 = vmatprep.subr.bf16.mxu1 %v589_v14 }
  0x14   :  { %534 = vmatpush3.bf16.msra.mxu0 %v588_v13 }
  0x15   :  { %535 = vmatprep.subr.bf16.mxu0 %v590_v15  ;;  %514 = vmatpush3.bf16.msra.mxu1 %v589_v14 }
  0x16   :  { %515 = vmatprep.subr.bf16.mxu1 %v591_v16 }
  0x17   :  { %7 = vsyncpa [#allocation3], 0  ;;  %v594_v19 = vld [vmem:[%s755_s1 + $0x38] sm:$0xff]   ;;  %v596_v21 = vld [vmem:[%s755_s1 + $0x80] sm:$0xff]   ;;  %v17_v22 = vlaneseq  ;;  %v629_v30 = vmov 1.0|1.0  }
  0x18   :  { %536 = vmatpush3.bf16.msra.mxu0 %v590_v15  ;;  %v595_v20 = vld [vmem:[%s755_s1 + $0x78] sm:$0xff]   ;;  %v597_v29 = vld [vmem:[%s755_s1 + $0x88] sm:$0xff]   ;;  %v598_v31 = vld [vmem:[%s755_s1 + $0x90] sm:$0xff]   ;;  %vm386_vm6 = vcmask 261120   ;;  %s630_s7 = smov [#allocation2]  }
  0x19   :  { %537 = vmatprep.subr.bf16.mxu0 %v592_v17  ;;  %516 = vmatpush3.bf16.msra.mxu1 %v591_v16  ;;  %v18_v25 = vand.u32 127, %v17_v22  ;;  %v599_v32 = vld [vmem:[%s755_s1 + $0x98] sm:$0xff]   ;;  %v600_v33 = vld [vmem:[%s755_s1 + $0xa0] sm:$0xff]   ;;  %v601_v34 = vld [vmem:[%s755_s1 + $0xa8] sm:$0xff]   ;;  %s396_s8 = sshll.u32 %s630_s7, 4  ;;  %s397_s8 = int_to_ptr.vmem [resolvable:$true] %s396_s8 }
  0x1a   :  { %517 = vmatprep.subr.bf16.mxu1 %v593_v18  ;;  %v602_v35 = vld [vmem:[%s755_s1 + $0xb0] sm:$0xff]   ;;  %v603_v36 = vld [vmem:[%s755_s1 + $0xb8] sm:$0xff]   ;;  %s604_s1 = scalar_lea.vmem %s397_s8, 512  ;;  %p609_p1 = scmp.lt.s32.totalorder %s397_s8, %s397_s8 }
  0x1b   :  { %p605_p0 = scmp.ne.s32.totalorder %s397_s8, %s604_s1  ;;  %p610_p2 = scmp.lt.s32.totalorder %s604_s1, %s604_s1 }
  0x1c   :  { %538 = vmatpush3.bf16.msra.mxu0 %v592_v17 }
  0x1d   :  { %539 = vmatprep.subr.bf16.mxu0 %v594_v19  ;;  %518 = vmatpush3.bf16.msra.mxu1 %v593_v18  ;;  %p611_p3 = por %p610_p2, %p609_p1 }
  0x1e   :  { %519 = vmatprep.subr.bf16.mxu1 %v595_v20 }
  0x1f   :  { %p612_p4 = pnand %p611_p3, %p605_p0 }
  0x20   :  { %540 = vmatpush3.bf16.msra.mxu0 %v594_v19 }
  0x21   :  { %545 = vmatprep.subr.bf16.mxu0 %v596_v21  ;;  %520 = vmatpush3.bf16.msra.mxu1 %v595_v20 }
  0x81   :  { %v27_v23 = vpop.permute.xlu1 %26  ;;  %v21_v24 = vpop.permute.xlu0 %20 }
  0x82   :  { %vm33_vm0 = vcmp.eq.s32.totalorder %v18_v25, %v27_v23  ;;  %vm31_vm3 = vcmp.eq.s32.totalorder %v18_v25, %v21_v24 }
  0x85   :  { %v30_v26 = vpop.permute.xlu1 %29  ;;  %v24_v27 = vpop.permute.xlu0 %23 }
  0x86   :  { %vm34_vm1 = vcmp.eq.s32.totalorder %v18_v25, %v30_v26  ;;  %vm32_vm2 = vcmp.eq.s32.totalorder %v18_v25, %v24_v27 }
  0x87   :  { %vm711_vm4 = vmpackc.low %vm34_vm1, %vm33_vm0 }
  0x88   :  { %vm431_vm5 = vmpackc.low %vm32_vm2, %vm31_vm3 }
  0x89   :  { %521 = vmatprep.mubr.msk.bf16.mxu1 %vm431_vm5, %v629_v30  ;;  %541 = vmatprep.mubr.msk.bf16.mxu0 %vm431_vm5, %v629_v30 }
  0x8a   :  { %522 = vmatmul.mubr.msk.bf16.vlgmr.msra.gmra.mrb[0].mxu1 %vm711_vm4, %v629_v30  ;;  %542 = vmatmul.mubr.msk.bf16.vlgmr.msra.gmra.mrb[0].mxu0 %vm711_vm4, %v629_v30 }
  0x8b   :  { %546 = vmatpush3.bf16.msra.mxu0 %v596_v21  ;;  %561 = vmatprep.mubr.msk.bf16.mxu0 %vm431_vm5, %v629_v30 }
  0x8c   :  { %547 = vmatprep.subr.bf16.mxu0 %v597_v29 }
  0x8f   :  { %548 = vmatpush3.bf16.msra.mxu0 %v597_v29 }
  0x90   :  { %549 = vmatprep.subr.bf16.mxu0 %v598_v31 }
  0x93   :  { %550 = vmatpush3.bf16.msra.mxu0 %v598_v31 }
  0x94   :  { %551 = vmatprep.subr.bf16.mxu0 %v599_v32 }
  0x97   :  { %552 = vmatpush3.bf16.msra.mxu0 %v599_v32 }
  0x98   :  { %553 = vmatprep.subr.bf16.mxu0 %v600_v33 }
  0x9b   :  { %554 = vmatpush3.bf16.msra.mxu0 %v600_v33 }
  0x9c   :  { %555 = vmatprep.subr.bf16.mxu0 %v601_v34 }
  0x9f   :  { %556 = vmatpush3.bf16.msra.mxu0 %v601_v34 }
  0xa0   :  { %557 = vmatprep.subr.bf16.mxu0 %v602_v35 }
  0xa3   :  { %558 = vmatpush3.bf16.msra.mxu0 %v602_v35 }
  0xa4   :  { %559 = vmatprep.subr.bf16.mxu0 %v603_v36 }
  0xa7   :  { %560 = vmatpush3.bf16.msra.mxu0 %v603_v36 }
  0xaa   :  { %562 = vmatmul.mubr.msk.bf16.vlgmr.msra.gmra.mrb[0].mxu0 %vm711_vm4, %v629_v30 }
 0x15d   :  { %v523_v37 = vpop.f32.mrb[0].mxu1 }
 0x15e   :  { %v156_v38 = vpop.f32.mrb[1].mxu1 }
 0x15f   :  { %v524_v39 = vpop.f32.mrb[2].mxu1 }
 0x160   :  { %v159_v40 = vpop.f32.mrb[3].mxu1 }
 0x17d   :  { %v563_v41 = vpop.f32.mrb[0].mxu0 }
 0x17e   :  { %v565_v42 = vadd.f32 %v563_v41, %v523_v37  ;;  %v367_v43 = vpop.f32.mrb[1].mxu0 }
 0x17f   :  { %v566_v44 = vadd.f32 %v367_v43, %v156_v38  ;;  %v564_v45 = vpop.f32.mrb[2].mxu0 }
 0x180   :  { %389 = vst.msk [vmem:[#allocation2 + $0x10] sm:$0xff] %vm386_vm6, %v565_v42  ;;  %v567_v46 = vadd.f32 %v564_v45, %v524_v39  ;;  %v370_v47 = vpop.f32.mrb[3].mxu0 }
 0x181   :  { %387 = vst.msk [vmem:[#allocation2] sm:$0xff] %vm386_vm6, %v566_v44  ;;  %v568_v48 = vadd.f32 %v370_v47, %v159_v40 }
 0x182   :  { %390 = vst.msk [vmem:[#allocation2 + $0x18] sm:$0xff] %vm386_vm6, %v567_v46 }
 0x183   :  { %388 = vst.msk [vmem:[#allocation2 + $0x8] sm:$0xff] %vm386_vm6, %v568_v48 }
 0x184   :  { %615 = shalt.err (!%p612_p4)
}
 0x185   :  { %s616_s11 = scalar_lea.hbm %s756_s2, 512 }
 0x186   :  { %p617_p5 = scmp.ne.s32.totalorder %s756_s2, %s616_s11  ;;  %p620_p6 = scmp.lt.u32.totalorder %s616_s11, %s756_s2 }
 0x188   :  { %p622_p7 = pnand %p620_p6, %p617_p5 }
 0x18a   :  { %625 = shalt.err (!%p622_p7)
}
 0x18b   :  { %s631_s16 = smov 128   ;;  %s632_s17 = smov 8  }
 0x18c   :  { %402 = dma.vmem_to_hbm [thread:$0]  %s397_s8, 512, %s756_s2, [#allocation3], %s631_s16, %s631_s16, %s632_s17  }
 0x18d   :  { %626 = dma.done.wait [#allocation3], 512  }
 0x18e   :  { %627 = vsyncadd [#allocation3], 4294966784 }
 0x18f   :  { %406 = vsyncpa [#allocation3], 1 }

</bundles_post_ra>
